<compile_context>
chip_gen: v7x
topology: tpu7x:2x2x1
jax: 0.10.0
libtpu: 0.0.40
codegen_flags: <defaults>
</compile_context>

<pallas_src>
import jax
import jax.numpy as jnp
from jax.experimental import pallas as pl
from jax.experimental.pallas import tpu as pltpu


def _energy_kernel(xt_ref, w_ref, b_ref, o_ref):
    # xt_ref: (d_in, tb)  -- batch on the lane axis
    # w_ref : (d_in, 1)   -- folded weight column (resident in VMEM)
    # b_ref : (1, 1)      -- folded bias (SMEM scalar)
    # o_ref : (1, tb)     -- lane-dense output row
    prod = xt_ref[...] * w_ref[...]               # VPU broadcast multiply
    acc = jnp.sum(prod, axis=0, keepdims=True)    # XLU sublane reduce -> (1, tb)
    o_ref[...] = (acc + b_ref[0, 0]).astype(o_ref.dtype)


def single_energy_forward(x, w1, b1, w2, b2, *, tb=None):
    """Fused Linear(input->intermediate) -> Linear(hidden->1) forward.

    x : (B, input_size) float32
    w1: (input_size, intermediate_size)   b1: (intermediate_size,)
    w2: (hidden_size, 1)                  b2: (1,)
    returns (B, 1) float32
    """
    B, d_in = x.shape

    # --- fold the two linear layers (exact: no nonlinearity in between) ----
    w_eff = jnp.dot(w1, w2, preferred_element_type=jnp.float32)          # (d_in, 1)
    b_eff = (jnp.dot(b1, w2, preferred_element_type=jnp.float32)
             + b2).reshape(1, 1).astype(jnp.float32)                     # (1, 1)

    # --- batch-on-lanes layout; tile the lane axis --------------------------
    if tb is None:
        tb = 2048 if B >= 8192 else 128   # lane-aligned, multi-step grid
    assert tb % 128 == 0, "batch tile must be lane-aligned (multiple of 128)"

    b_pad = ((B + tb - 1) // tb) * tb
    xt = x.T                              # (d_in, B): batch on last (lane) axis
    if b_pad != B:
        xt = jnp.pad(xt, ((0, 0), (0, b_pad - B)))

    grid = (b_pad // tb,)
    out = pl.pallas_call(
        _energy_kernel,
        out_shape=jax.ShapeDtypeStruct((1, b_pad), x.dtype),
        grid_spec=pltpu.PrefetchScalarGridSpec(
            num_scalar_prefetch=0,
            grid=grid,
            in_specs=[
                pl.BlockSpec((d_in, tb), lambda i: (0, i)),          # x^T tile (lane-dense)
                pl.BlockSpec((d_in, 1), lambda i: (0, 0)),           # folded weight column
                pl.BlockSpec(memory_space=pltpu.MemorySpace.SMEM),   # folded bias scalar
            ],
            out_specs=pl.BlockSpec((1, tb), lambda i: (0, i)),       # lane-dense output
        ),
        compiler_params=pltpu.CompilerParams(
            dimension_semantics=("parallel",),        # shard batch tiles across TCs
            vmem_limit_bytes=32 * 1024 * 1024,        # headroom if tb is raised (v5e default 16 MiB)
        ),
    )(xt, w_eff, b_eff)

    return out[0, :B].reshape(B, 1)


def init_params(key, input_size, intermediate_size, hidden_size):
    """Deterministic init mimicking torch.nn.Linear defaults:
    U(-1/sqrt(fan_in), 1/sqrt(fan_in)) for both weight and bias."""
    k1, k2, k3, k4 = jax.random.split(key, 4)
    bound1 = 1.0 / jnp.sqrt(input_size)
    # stored pre-transposed: (in_features, out_features)
    w1 = jax.random.uniform(k1, (input_size, intermediate_size),
                            jnp.float32, -bound1, bound1)
    b1 = jax.random.uniform(k2, (intermediate_size,),
                            jnp.float32, -bound1, bound1)
    bound2 = 1.0 / jnp.sqrt(hidden_size)
    w2 = jax.random.uniform(k3, (hidden_size, 1), jnp.float32, -bound2, bound2)
    b2 = jax.random.uniform(k4, (1,), jnp.float32, -bound2, bound2)
    return w1, b1, w2, b2


if __name__ == "__main__":
    # forward requires intermediate_size == hidden_size (see module note above)
    input_size, intermediate_size, hidden_size = 16, 32, 32
    batch = 512   # -> 4 lane-dense tiles of 128: pipelined + megacore-shardable

    key = jax.random.PRNGKey(0)
    kx, kp = jax.random.split(key)
    x = jax.random.normal(kx, (batch, input_size), jnp.float32)
    w1, b1, w2, b2 = init_params(kp, input_size, intermediate_size, hidden_size)

    out = single_energy_forward(x, w1, b1, w2, b2)
    out = jax.block_until_ready(out)

    # pure-JAX reference check (two explicit matmuls, as in the PyTorch module)
    ref = (x @ w1 + b1) @ w2 + b2
    assert out.shape == (batch, 1)
    assert jnp.allclose(out, ref, atol=1e-5, rtol=1e-5)

    print("KERNEL_OK")
</pallas_src>

<mosaic_0001>
module attributes {stable_mosaic.version = 11 : i64} {
  func.func @_energy_kernel(%arg0: i32, %arg1: memref<16x128xf32, #tpu.memory_space<vmem>>, %arg2: memref<16x1xf32, #tpu.memory_space<vmem>>, %arg3: memref<1x1xf32, #tpu.memory_space<smem>>, %arg4: memref<1x128xf32, #tpu.memory_space<vmem>>) attributes {dimension_semantics = [#tpu.dimension_semantics<parallel>], iteration_bounds = array<i64: 4>, scalar_prefetch = 0 : i64, scratch_operands = 0 : i64, tpu.core_type = #tpu.core_type<tc>, window_params = [{transform_indices = @transform_0, window_bounds = array<i64: 16, 128>}, {pipeline_mode = #tpu.pipeline_mode<synchronous>, transform_indices = @transform_1, window_bounds = array<i64: 16, 1>}, {transform_indices = @transform_2, window_bounds = array<i64: 1, 1>}, {transform_indices = @transform_3, window_bounds = array<i64: 1, 128>}]} {
    %c0 = arith.constant 0 : index
    %c0_0 = arith.constant 0 : index
    %0 = vector.load %arg1[%c0, %c0_0] : memref<16x128xf32, #tpu.memory_space<vmem>>, vector<16x128xf32>
    %c0_1 = arith.constant 0 : index
    %c0_2 = arith.constant 0 : index
    %1 = vector.load %arg2[%c0_1, %c0_2] : memref<16x1xf32, #tpu.memory_space<vmem>>, vector<16x1xf32>
    %2 = vector.broadcast %1 : vector<16x1xf32> to vector<16x128xf32>
    %3 = arith.mulf %0, %2 : vector<16x128xf32>
    %cst = arith.constant dense<0.000000e+00> : vector<128xf32>
    %4 = vector.multi_reduction <add>, %3, %cst [0] : vector<16x128xf32> to vector<128xf32>
    %5 = vector.shape_cast %4 : vector<128xf32> to vector<1x128xf32>
    %c0_3 = arith.constant 0 : index
    %c0_4 = arith.constant 0 : index
    %6 = memref.load %arg3[%c0_3, %c0_4] : memref<1x1xf32, #tpu.memory_space<smem>>
    %7 = vector.broadcast %6 : f32 to vector<1x128xf32>
    %8 = arith.addf %5, %7 : vector<1x128xf32>
    %c0_5 = arith.constant 0 : index
    %c0_6 = arith.constant 0 : index
    %9 = vector.load %arg4[%c0_5, %c0_6] : memref<1x128xf32, #tpu.memory_space<vmem>>, vector<1x128xf32>
    tpu.vector_store %arg4[%c0_5, %c0_6], %8 {strides = array<i32>} : memref<1x128xf32, #tpu.memory_space<vmem>>, vector<1x128xf32>,
    return
  }
  func.func @transform_0(%arg0: i32) -> (i32, i32) {
    %c0_i32 = arith.constant 0 : i32
    %c0_i32_0 = arith.constant 0 : i32
    return %c0_i32, %arg0 : i32, i32
  }
  func.func @transform_1(%arg0: i32) -> (i32, i32) {
    %c0_i32 = arith.constant 0 : i32
    %c0_i32_0 = arith.constant 0 : i32
    %c0_i32_1 = arith.constant 0 : i32
    return %c0_i32, %c0_i32_0 : i32, i32
  }
  func.func @transform_2(%arg0: i32) -> (i32, i32) {
    %c0_i32 = arith.constant 0 : i32
    %c0_i32_0 = arith.constant 0 : i32
    %c0_i32_1 = arith.constant 0 : i32
    return %c0_i32, %c0_i32_0 : i32, i32
  }
  func.func @transform_3(%arg0: i32) -> (i32, i32) {
    %c0_i32 = arith.constant 0 : i32
    %c0_i32_0 = arith.constant 0 : i32
    return %c0_i32, %arg0 : i32, i32
  }
}

</mosaic_0001>

<bundles_post_ra>
// kernel: tpu_custom_call.1
= control target key start
LH: loop header
LB: loop body
LE: loop exit
PB: predicated region body
PF: predicated region fallthrough
CT: control target
= control target key end

     0   :  { %s649_s0 = inlined_call_operand.hbm [shape: f32[16,512], index: 0, kind: input, shape index: {}]   ;;  %s650_s1 = inlined_call_operand.vmem [shape: f32[16,1], index: 1, kind: input, shape index: {}]   ;;  %s651_s2 = inlined_call_operand.<no memory space> [shape: f32[1,1], index: 2, kind: input, shape index: {}]   ;;  %s652_s3 = inlined_call_operand.hbm [shape: f32[1,512], index: 3, kind: output, shape index: {}]  }
   0x1   :  { %8 = sst [smem:[#allocation2]] %s651_s2 }
   0x2   :  { %9 = vsyncpa [#allocation4], 0 }
   0x3   :  { %11 = vsyncpa [#allocation4 + $0x1], 0 }
   0x4   :  { %12 = vsyncpa [#allocation5], 0 }
   0x5   :  { %14 = vsyncpa [#allocation5 + $0x1], 0  ;;  %s482_s14 = smov 0   ;;  %s484_s15 = smov 0  }
   0x6   :  { %s486_s16 = smov 0   ;;  %s488_s17 = smov 0  }
   0x7 LB: > { %s503_s2 = sadd.s32 4294967295, %s451_s17   ;;  %s294_s18 = sadd.s32 4294967294, %s451_s17   ;;  %s451_s17 = sphi %s488_s17, %s665_s17   ;;  %s447_s16 = sphi %s486_s16, %s664_s16   ;;  %s443_s15 = sphi %s484_s15, %s663_s15   ;;  %s439_s14 = sphi %s482_s14, %s662_s14  }
   0x8   : > { %s507_s19 = sadd.s32 1, %s451_s17   ;;  %s27_s20 = sadd.s32 1, %s447_s16 }
   0x9   : > { %s24_s21 = ssub.s32 %s451_s17, %s507_s19  ;;  %p34_p0 = scmp.ne.s32.totalorder %s447_s16, %s443_s15 }
   0xa   : > { %p25_p1 = scmp.eq.s32.totalorder %s24_s21, 0  ;;  %p35_p2 = scmp.eq.s32.totalorder %s451_s17, 0 }
   0xb   : > { %p40_p3 = scmp.ne.s32.totalorder %s443_s15, %s439_s14  ;;  %p41_p4 = scmp.eq.s32.totalorder %s503_s2, 0 }
   0xc   : > { %s519_s22 = scalar_select %p25_p1, %s447_s16, %s27_s20  }
   0xd   : > { %p521_p5 = por %p35_p2, %p34_p0  ;;  %p525_p6 = por %p41_p4, %p40_p3 }
   0xe   : > { %p106_p7 = scmp.eq.s32.totalorder %s503_s2, 3  ;;  %p112_p8 = scmp.eq.s32.totalorder %s294_s18, 3 }
   0xf   : > { %p316_p9 = scmp.lt.s32.totalorder %s451_s17, 4  ;;  %s138_s27 = sand.u32 1, %s447_s16  }
  0x10   : > { %p531_p10 = por %p106_p7, %p34_p0  ;;  %p535_p11 = por %p112_p8, %p40_p3 }
  0x11   : > { %s298_s28 = sshll.u32 %s451_s17, 7  ;;  %s297_s29 = sshll.u32 %s138_s27, 4 }
  0x12   : > { %s656_s25 = scalar_select %p531_p10, 1, 0 }
  0x13   : > { %s657_s26 = scalar_select %p535_p11, 1, 0 }
  0x14   : > { %s544_s5 = scalar_lea.hbm %s649_s0, %s298_s28  ;;  %s142_s6 = scalar_lea.vmem [#allocation3], %s297_s29 }
  0x15   : > { %s148_s7 = sshll.u32 %s142_s6, 4  ;;  %p548_p12 = pnand %p316_p9, %p521_p5  ;;  %s552_s7 = int_to_ptr.vmem [resolvable:$true] %s148_s7 }
  0x16   : > { %s555_s9 = scalar_lea.sflag [#allocation4], %s138_s27  ;;  %s355_s10 = scalar_lea.hbm %s544_s5, 256 }
  0x17   : > { %p356_p0 = scmp.ne.s32.totalorder %s544_s5, %s355_s10  ;;  %p357_p1 = pneg %p548_p12 }
  0x18   : > { %s360_s13 = scalar_lea.hbm %s649_s0, 1024  ;;  %p361_p4 = scmp.lt.u32.totalorder %s544_s5, %s649_s0 }
  0x19   : > { %p358_p2 = pnand %p357_p1, %p356_p0  ;;  %p362_p5 = scmp.lt.u32.totalorder %s360_s13, %s355_s10 }
  0x1a   : > { %p364_p8 = scmp.lt.u32.totalorder %s355_s10, %s544_s5 }
  0x1b   : > { %p359_p3 = pneg %p358_p2  ;;  %p363_p7 = por %p362_p5, %p361_p4 }
  0x1d   : > { %p365_p9 = por %p364_p8, %p363_p7 }
  0x1f   : > { %p366_p13 = pnand %p365_p9, %p359_p3 }
  0x21   : > { %369 = shalt.err (!%p366_p13)
}
  0x22   : > { %s370_s21 = scalar_lea.vmem %s552_s7, 256  ;;  %s453_s23 = smov [#allocation3]  }
  0x23   : > { %p371_p0 = scmp.ne.s32.totalorder %s552_s7, %s370_s21  ;;  %s375_s27 = sshll.u32 %s453_s23, 4  ;;  %s376_s27 = int_to_ptr.vmem [resolvable:$false] %s375_s27 }
  0x24   : > { %s377_s28 = scalar_lea.vmem %s376_s27, 512  ;;  %p378_p10 = scmp.lt.s32.totalorder %s552_s7, %s376_s27 }
  0x25   : > { %p373_p2 = pnand %p371_p0, %p357_p1  ;;  %p379_p4 = scmp.lt.s32.totalorder %s377_s28, %s370_s21 }
  0x27   : > { %p374_p11 = pneg %p373_p2  ;;  %p380_p5 = por %p379_p4, %p378_p10 }
  0x29   : > { %p381_p7 = pnand %p380_p5, %p374_p11 }
  0x2b   : > { %384 = shalt.err (!%p381_p7)
}
  0x2c   : > { %s454_s29 = smov 512   ;;  %s455_s30 = smov 128  }
  0x2d   : > { %s456_s4 = smov 8   ;;  %p156_p13 = scmp.lt.s32.totalorder %s451_s17, 5 }
  0x2e   : > { %311 = dma.hbm_to_vmem [thread:$0]  (!%p548_p12), %s544_s5, 256, %s552_s7, %s555_s9, %s454_s29, %s455_s30, %s456_s4  }
  0x2f   : > { %p659_p1 = scmp.ge.s32.totalorder %s451_s17, 1 }
  0x31   : > { %p157_p3 = pnand %p659_p1, %p156_p13 }
  0x32   : > { %s587_s6 = sand.u32 (!%p157_p3), 1, %s443_s15  }
  0x33   : > { %160 = sbr.rel (%p157_p3) target bundleno = 225 (0xe1), region = 32  ;;  %s300_s10 = sshll.u32 (!%p157_p3), %s587_s6, 4 }
  0x34   : > { %s163_s11 = scalar_lea.sflag (!%p157_p3), [#allocation4], %s587_s6  ;;  %s166_s12 = scalar_lea.vmem (!%p157_p3), [#allocation3], %s300_s10 }
  0x3a   : > { %430 = dma.done.wait (%p525_p6), %s163_s11, 256  }
  0x3b   : > { %432 = vsyncadd (%p525_p6), %s163_s11, 4294967040  ;;  %v457_v0 = vmov 0   ;;  %v190_v1 = vld [vmem:[%s650_s1] sm:$0xff]  ;;  %v191_v2 = vld [vmem:[%s650_s1 + $0x8] sm:$0xff]  ;;  %s211_s24 = sld [smem:[#allocation2]]  ;;  %s301_s13 = sshll.u32 %s503_s2, 4 }
  0x3c   : > { %354 = vset.pattern.permute.xlu0 %v457_v0  ;;  %v188_v4 = vld [vmem:[%s166_s12] sm:$0xff]  ;;  %v189_v5 = vld [vmem:[%s166_s12 + $0x8] sm:$0xff]  ;;  %s187_s18 = scalar_lea.vmem [#allocation6], %s587_s6  ;;  %s606_s27 = scalar_lea.hbm %s652_s3, %s301_s13 }
  0x3d   : > { %194 = vperm.xlu0 %354, %v190_v1   ;;  %s228_s20 = sshll.u32 %s187_s18, 4  ;;  %s216_s28 = scalar_lea.sflag [#allocation5], %s587_s6  ;;  %s608_s20 = int_to_ptr.vmem [resolvable:$true] %s228_s20 }
  0x3e   : > { %s385_s29 = scalar_lea.vmem %s608_s20, 16  ;;  %p660_p10 = scmp.ne.s32.totalorder %s656_s25, 0 }
  0x3f   : > { %p386_p6 = scmp.ne.s32.totalorder %s608_s20, %s385_s29  ;;  %s458_s2 = smov [#allocation6]  }
  0x40   : > { %s389_s30 = sshll.u32 %s458_s2, 4  ;;  %s390_s30 = int_to_ptr.vmem [resolvable:$false] %s389_s30 }
  0x41   : > { %199 = vperm.xlu0 %354, %v191_v2   ;;  %v212_v15 = vstv %s211_s24  ;;  %p387_p11 = pnand %p386_p6, %p660_p10  ;;  %s391_s4 = scalar_lea.vmem %s390_s30, 32 }
  0x42   : > { %p392_p8 = scmp.lt.s32.totalorder %s608_s20, %s390_s30  ;;  %p393_p9 = scmp.lt.s32.totalorder %s391_s4, %s385_s29 }
  0x43   : > { %p388_p12 = pneg %p387_p11 }
  0x44   : > { %p394_p0 = por %p393_p9, %p392_p8 }
  0x46   : > { %p395_p2 = pnand %p394_p0, %p388_p12 }
  0xbc   : > { %v195_v3 = vpop.permute.xlu0 %194 }
  0xbd   : > { %v202_v7 = vmul.f32 %v195_v3, %v188_v4 }
  0xc0   : > { %v200_v6 = vpop.permute.xlu0 %199 }
  0xc1   : > { %v203_v8 = vmul.f32 %v200_v6, %v189_v5 }
  0xc3   : > { %v204_v9 = vadd.f32 %v203_v8, %v202_v7 }
  0xc5   : > { %v205_v10 = vrot.slane %v204_v9, 4 }
  0xc7   : > { %v206_v11 = vadd.f32 %v205_v10, %v204_v9 }
  0xc9   : > { %v207_v12 = vrot.slane %v206_v11, 2 }
  0xcb   : > { %v208_v13 = vadd.f32 %v207_v12, %v206_v11 }
  0xcd   : > { %v209_v14 = vrot.slane %v208_v13, 1 }
  0xcf   : > { %v210_v16 = vadd.f32 %v209_v14, %v208_v13 }
  0xd1   : > { %v213_v17 = vadd.f32 %v212_v15, %v210_v16 }
  0xd3   : > { %214 = vst [vmem:[%s187_s18] sm:$0x1] %v213_v17 }
  0xd4   : > { %398 = shalt.err (!%p395_p2)
}
  0xd5   : > { %s399_s6 = scalar_lea.hbm %s606_s27, 16  ;;  %s403_s12 = scalar_lea.hbm %s652_s3, 64 }
  0xd6   : > { %p400_p4 = scmp.ne.s32.totalorder %s606_s27, %s399_s6  ;;  %p404_p13 = scmp.lt.u32.totalorder %s606_s27, %s652_s3 }
  0xd7   : > { %p405_p1 = scmp.lt.u32.totalorder %s403_s12, %s399_s6  ;;  %p407_p6 = scmp.lt.u32.totalorder %s399_s6, %s606_s27 }
  0xd8   : > { %p401_p5 = pnand %p400_p4, %p660_p10 }
  0xd9   : > { %p406_p3 = por %p405_p1, %p404_p13 }
  0xda   : > { %p402_p7 = pneg %p401_p5 }
  0xdb   : > { %p408_p11 = por %p407_p6, %p406_p3 }
  0xdd   : > { %p409_p12 = pnand %p408_p11, %p402_p7 }
  0xdf   : > { %412 = shalt.err (!%p409_p12)
}
  0xe0   : > { %306 = dma.vmem_to_hbm [thread:$0]  (%p660_p10), %s608_s20, 16, %s606_s27, %s216_s28  }
  0xe1 PF: > { %p317_p8 = scmp.ge.s32.totalorder %s451_s17, 2  ;;  %s240_s8 = sand.u32 1, %s439_s14  }
  0xe2   : > { %p661_p9 = scmp.ne.s32.totalorder %s657_s26, 0  ;;  %s241_s9 = scalar_lea.sflag [#allocation5], %s240_s8 }
  0xe4   : > { %p313_p0 = pnand %p317_p8, %p661_p9 }
  0xe6   : > { %434 = dma.done.wait (!%p313_p0), %s241_s9, 16  }
  0xe7   : > { %436 = vsyncadd (!%p313_p0), %s241_s9, 4294967280  ;;  %p17_p2 = scmp.ge.s32.totalorder %s507_s19, 6   ;;  %s662_s14 = smov %s443_s15 }
  0xe8   : > { %s663_s15 = smov %s447_s16  ;;  %s664_s16 = smov %s519_s22 }
  0xe9   : > { %s665_s17 = smov %s507_s19  ;;  %19 = sbr.rel (!%p17_p2) target bundleno = 7 (0x7), region = 77 }
  0xf0   :  { %245 = vsyncpa [#allocation4], 1 }
  0xf1   :  { %247 = vsyncpa [#allocation4 + $0x1], 1 }
  0xf2   :  { %248 = vsyncpa [#allocation5], 1 }
  0xf3   :  { %250 = vsyncpa [#allocation5 + $0x1], 1 }

</bundles_post_ra>
